<compile_context>
chip_gen: v7x
topology: tpu7x:2x2x1
jax: 0.10.0
libtpu: 0.0.40
codegen_flags: <defaults>
</compile_context>

<pallas_src>
import functools

import jax
import jax.numpy as jnp
import numpy as np
from jax.experimental import pallas as pl
from jax.experimental.pallas import tpu as pltpu


# ----------------------------------------------------------------------------
# tiling helper
# ----------------------------------------------------------------------------
def _pick_lane_tile(hw, vmem_bytes_per_lane, cap_bytes=8 << 20):
    """Largest multiple-of-128 divisor of hw whose blocks fit the VMEM cap.

    Falls back to the full extent (always a legal BlockSpec last dim) when H*W
    is not a multiple of 128 -- no padding or tail masking is ever required.
    """
    if hw % 128 != 0:
        return hw
    best = None
    for t in range(128, hw + 1, 128):
        if hw % t == 0 and t * vmem_bytes_per_lane <= cap_bytes:
            best = t
    return best if best is not None else hw


# ----------------------------------------------------------------------------
# kernels
# ----------------------------------------------------------------------------
def _layernorm_tile(x_ref, g_ref, b_ref, *, eps, inv_c):
    """Normalize one (C, T) tile in f32.  x_ref block is (1, C, T)."""
    x = x_ref[0].astype(jnp.float32)                        # (C, T)
    s1 = jnp.sum(x, axis=0, keepdims=True)                  # (1, T)
    s2 = jnp.sum(x * x, axis=0, keepdims=True)              # single-pass stats
    mean = s1 * inv_c
    var = jnp.maximum(s2 * inv_c - mean * mean, 0.0)        # unbiased=False
    inv_std = 1.0 / (jnp.sqrt(var) + eps)                   # eps added to std (CvT LN)
    return (x - mean) * inv_std * g_ref[...] + b_ref[...]   # g, b are (C, 1)


def _channel_layernorm_kernel(x_ref, g_ref, b_ref, o_ref, *, eps, inv_c):
    o_ref[0] = _layernorm_tile(x_ref, g_ref, b_ref,
                               eps=eps, inv_c=inv_c).astype(o_ref.dtype)


def _prenorm_pointwise_kernel(x_ref, g_ref, b_ref, w_ref, o_ref, *,
                              eps, inv_c, mxu_dtype):
    xn = _layernorm_tile(x_ref, g_ref, b_ref, eps=eps, inv_c=inv_c)
    # `fn` fused in VMEM: (Cout, C) @ (C, T) -> (Cout, T); f32 accumulate.
    y = jnp.dot(w_ref[...], xn.astype(mxu_dtype),
                preferred_element_type=jnp.float32)
    o_ref[0] = y.astype(o_ref.dtype)


# ----------------------------------------------------------------------------
# wrappers
# ----------------------------------------------------------------------------
def channel_layernorm(x_nchw, g, b, *, eps=1e-5):
    """CvT channel LayerNorm over dim=1 of an NCHW tensor (standalone kernel)."""
    n, c, h, w = x_nchw.shape
    hw = h * w
    x3 = x_nchw.reshape(n, c, hw)                           # free view, NCHW kept
    itemsize = jnp.dtype(x_nchw.dtype).itemsize
    t = _pick_lane_tile(hw, 4 * c * itemsize)               # in+out, double-buffered

    kernel = functools.partial(_channel_layernorm_kernel,
                               eps=float(eps), inv_c=1.0 / c)
    out = pl.pallas_call(
        kernel,
        out_shape=jax.ShapeDtypeStruct((n, c, hw), x_nchw.dtype),
        grid_spec=pltpu.PrefetchScalarGridSpec(
            num_scalar_prefetch=0,
            grid=(n, hw // t),
            in_specs=[
                pl.BlockSpec((1, c, t), lambda i, j: (i, 0, j)),
                pl.BlockSpec((c, 1), lambda i, j: (0, 0)),
                pl.BlockSpec((c, 1), lambda i, j: (0, 0)),
            ],
            out_specs=pl.BlockSpec((1, c, t), lambda i, j: (i, 0, j)),
        ),
        compiler_params=pltpu.CompilerParams(
            dimension_semantics=("parallel", "parallel")),
    )(x3,
      jnp.reshape(g, (c, 1)).astype(jnp.float32),
      jnp.reshape(b, (c, 1)).astype(jnp.float32))
    return out.reshape(n, c, h, w)


def pre_norm_pointwise(x_nchw, g, b, w_oc, *, eps=1e-5):
    """Fused PreNorm forward for a channel-mixing fn: (1x1 conv) o LayerNorm."""
    n, c, h, w = x_nchw.shape
    hw = h * w
    c_out = w_oc.shape[0]
    assert w_oc.shape == (c_out, c)
    out_dtype = x_nchw.dtype
    mxu_dtype = (jnp.bfloat16 if jnp.dtype(out_dtype) == jnp.bfloat16
                 else jnp.float32)

    x3 = x_nchw.reshape(n, c, hw)                           # free view, NCHW kept
    in_it = jnp.dtype(x_nchw.dtype).itemsize
    out_it = jnp.dtype(out_dtype).itemsize
    t = _pick_lane_tile(hw, 2 * (c * in_it + c_out * out_it))

    kernel = functools.partial(_prenorm_pointwise_kernel, eps=float(eps),
                               inv_c=1.0 / c, mxu_dtype=mxu_dtype)
    out = pl.pallas_call(
        kernel,
        out_shape=jax.ShapeDtypeStruct((n, c_out, hw), out_dtype),
        grid_spec=pltpu.PrefetchScalarGridSpec(
            num_scalar_prefetch=0,
            grid=(n, hw // t),
            in_specs=[
                pl.BlockSpec((1, c, t), lambda i, j: (i, 0, j)),
                pl.BlockSpec((c, 1), lambda i, j: (0, 0)),
                pl.BlockSpec((c, 1), lambda i, j: (0, 0)),
                pl.BlockSpec((c_out, c), lambda i, j: (0, 0)),
            ],
            out_specs=pl.BlockSpec((1, c_out, t), lambda i, j: (i, 0, j)),
        ),
        compiler_params=pltpu.CompilerParams(
            dimension_semantics=("parallel", "parallel")),
    )(x3,
      jnp.reshape(g, (c, 1)).astype(jnp.float32),
      jnp.reshape(b, (c, 1)).astype(jnp.float32),
      w_oc.astype(mxu_dtype))
    return out.reshape(n, c_out, h, w)


def pre_norm_forward(params, x, fn, **kwargs):
    """General PreNorm: fn(LayerNorm(x), **kwargs) for an arbitrary JAX `fn`.

    # TODO(synk): `fn` is an arbitrary sub-module in the PyTorch code (CvT
    # attention / FFN); only channel-mixing fns are fused (pre_norm_pointwise),
    # everything else goes through the standalone LayerNorm kernel + plain JAX.
    """
    return fn(channel_layernorm(x, params["g"], params["b"], eps=params["eps"]),
              **kwargs)


# ----------------------------------------------------------------------------
if __name__ == "__main__":
    key = jax.random.PRNGKey(0)
    kx, kg, kb, kw = jax.random.split(key, 4)

    # Small shapes consistent with a CvT stage; C on sublanes, H*W (=256) on lanes.
    N, C, H, W = 2, 64, 16, 16
    COUT = 64
    EPS = 1e-5

    x = jax.random.normal(kx, (N, C, H, W), jnp.float32)
    g = 1.0 + 0.1 * jax.random.normal(kg, (C,), jnp.float32)   # PyTorch init g=1
    b = 0.1 * jax.random.normal(kb, (C,), jnp.float32)         # PyTorch init b=0
    w_fn = jax.random.normal(kw, (COUT, C), jnp.float32) / np.sqrt(C)
    params = {"g": g, "b": b, "eps": EPS}

    # --- fused PreNorm (LayerNorm + 1x1-conv fn in one pallas_call) ---------
    out = jax.block_until_ready(pre_norm_pointwise(x, g, b, w_fn, eps=EPS))
    assert out.shape == (N, COUT, H, W), out.shape
    assert bool(jnp.all(jnp.isfinite(out)))

    # --- pure-JAX reference --------------------------------------------------
    mean = jnp.mean(x, axis=1, keepdims=True)
    var = jnp.var(x, axis=1, keepdims=True)                   # ddof=0 (unbiased=False)
    normed_ref = ((x - mean) / (jnp.sqrt(var) + EPS)
                  * g.reshape(1, C, 1, 1) + b.reshape(1, C, 1, 1))
    ref = jnp.einsum("oc,nchw->nohw", w_fn, normed_ref,
                     precision=jax.lax.Precision.HIGHEST)

    # Fused output: tolerance covers MXU f32-matmul pass rounding.
    np.testing.assert_allclose(np.asarray(out), np.asarray(ref),
                               rtol=5e-3, atol=5e-3)

    # Standalone LayerNorm kernel: tight tolerance (the real regression guard).
    ln = jax.block_until_ready(channel_layernorm(x, g, b, eps=EPS))
    np.testing.assert_allclose(np.asarray(ln), np.asarray(normed_ref),
                               rtol=2e-5, atol=2e-5)

    # Generic PreNorm path (arbitrary fn applied on top of the LN kernel).
    fn = lambda y: jnp.einsum("oc,nchw->nohw", w_fn, y,
                              precision=jax.lax.Precision.HIGHEST)
    out_generic = jax.block_until_ready(pre_norm_forward(params, x, fn))
    np.testing.assert_allclose(np.asarray(out_generic), np.asarray(ref),
                               rtol=1e-4, atol=1e-4)

    print("KERNEL_OK")
</pallas_src>

<mosaic_0001>
module attributes {stable_mosaic.version = 11 : i64} {
  func.func @_prenorm_pointwise_kernel(%arg0: i32, %arg1: i32, %arg2: memref<1x64x256xf32, #tpu.memory_space<vmem>>, %arg3: memref<64x1xf32, #tpu.memory_space<vmem>>, %arg4: memref<64x1xf32, #tpu.memory_space<vmem>>, %arg5: memref<64x64xf32, #tpu.memory_space<vmem>>, %arg6: memref<1x64x256xf32, #tpu.memory_space<vmem>>) attributes {dimension_semantics = [#tpu.dimension_semantics<parallel>, #tpu.dimension_semantics<parallel>], iteration_bounds = array<i64: 2, 1>, scalar_prefetch = 0 : i64, scratch_operands = 0 : i64, tpu.core_type = #tpu.core_type<tc>, window_params = [{transform_indices = @transform_0, window_bounds = array<i64: 1, 64, 256>}, {pipeline_mode = #tpu.pipeline_mode<synchronous>, transform_indices = @transform_1, window_bounds = array<i64: 64, 1>}, {pipeline_mode = #tpu.pipeline_mode<synchronous>, transform_indices = @transform_2, window_bounds = array<i64: 64, 1>}, {pipeline_mode = #tpu.pipeline_mode<synchronous>, transform_indices = @transform_3, window_bounds = array<i64: 64, 64>}, {transform_indices = @transform_4, window_bounds = array<i64: 1, 64, 256>}]} {
    %c0 = arith.constant 0 : index
    %c0_0 = arith.constant 0 : index
    %c0_1 = arith.constant 0 : index
    %0 = vector.load %arg2[%c0, %c0_0, %c0_1] : memref<1x64x256xf32, #tpu.memory_space<vmem>>, vector<1x64x256xf32>
    %1 = vector.shape_cast %0 : vector<1x64x256xf32> to vector<64x256xf32>
    %cst = arith.constant dense<0.000000e+00> : vector<256xf32>
    %2 = vector.multi_reduction <add>, %1, %cst [0] : vector<64x256xf32> to vector<256xf32>
    %3 = vector.shape_cast %2 : vector<256xf32> to vector<1x256xf32>
    %4 = arith.mulf %1, %1 : vector<64x256xf32>
    %cst_2 = arith.constant dense<0.000000e+00> : vector<256xf32>
    %5 = vector.multi_reduction <add>, %4, %cst_2 [0] : vector<64x256xf32> to vector<256xf32>
    %6 = vector.shape_cast %5 : vector<256xf32> to vector<1x256xf32>
    %cst_3 = arith.constant 1.562500e-02 : f32
    %7 = vector.broadcast %cst_3 : f32 to vector<1x256xf32>
    %8 = arith.mulf %3, %7 : vector<1x256xf32>
    %cst_4 = arith.constant 1.562500e-02 : f32
    %9 = vector.broadcast %cst_4 : f32 to vector<1x256xf32>
    %10 = arith.mulf %6, %9 : vector<1x256xf32>
    %11 = arith.mulf %8, %8 : vector<1x256xf32>
    %12 = arith.subf %10, %11 : vector<1x256xf32>
    %cst_5 = arith.constant 0.000000e+00 : f32
    %13 = vector.broadcast %cst_5 : f32 to vector<1x256xf32>
    %14 = arith.maximumf %12, %13 : vector<1x256xf32>
    %15 = math.sqrt %14 : vector<1x256xf32>
    %cst_6 = arith.constant 9.99999974E-6 : f32
    %16 = vector.broadcast %cst_6 : f32 to vector<1x256xf32>
    %17 = arith.addf %15, %16 : vector<1x256xf32>
    %cst_7 = arith.constant 1.000000e+00 : f32
    %18 = vector.broadcast %cst_7 : f32 to vector<1x256xf32>
    %19 = arith.divf %18, %17 : vector<1x256xf32>
    %20 = vector.broadcast %8 : vector<1x256xf32> to vector<64x256xf32>
    %21 = arith.subf %1, %20 : vector<64x256xf32>
    %22 = vector.broadcast %19 : vector<1x256xf32> to vector<64x256xf32>
    %23 = arith.mulf %21, %22 : vector<64x256xf32>
    %c0_8 = arith.constant 0 : index
    %c0_9 = arith.constant 0 : index
    %24 = vector.load %arg3[%c0_8, %c0_9] : memref<64x1xf32, #tpu.memory_space<vmem>>, vector<64x1xf32>
    %25 = vector.broadcast %24 : vector<64x1xf32> to vector<64x256xf32>
    %26 = arith.mulf %23, %25 : vector<64x256xf32>
    %c0_10 = arith.constant 0 : index
    %c0_11 = arith.constant 0 : index
    %27 = vector.load %arg4[%c0_10, %c0_11] : memref<64x1xf32, #tpu.memory_space<vmem>>, vector<64x1xf32>
    %28 = vector.broadcast %27 : vector<64x1xf32> to vector<64x256xf32>
    %29 = arith.addf %26, %28 : vector<64x256xf32>
    %c0_12 = arith.constant 0 : index
    %c0_13 = arith.constant 0 : index
    %30 = vector.load %arg5[%c0_12, %c0_13] : memref<64x64xf32, #tpu.memory_space<vmem>>, vector<64x64xf32>
    %cst_14 = arith.constant dense<0.000000e+00> : vector<64x256xf32>
    %31 = tpu.matmul %30, %29, %cst_14 {dimension_numbers = #tpu.dot_dimension_numbers<[1], [0], [0], [1], [0, 0, 1, 1], [], []>} : vector<64x64xf32>, vector<64x256xf32>, vector<64x256xf32> -> vector<64x256xf32>
    %c0_15 = arith.constant 0 : index
    %c0_16 = arith.constant 0 : index
    %c0_17 = arith.constant 0 : index
    %32 = vector.load %arg6[%c0_15, %c0_16, %c0_17] : memref<1x64x256xf32, #tpu.memory_space<vmem>>, vector<1x64x256xf32>
    %33 = vector.shape_cast %32 : vector<1x64x256xf32> to vector<64x256xf32>
    %34 = vector.shape_cast %31 : vector<64x256xf32> to vector<1x64x256xf32>
    tpu.vector_store %arg6[%c0_15, %c0_16, %c0_17], %34 {strides = array<i32>} : memref<1x64x256xf32, #tpu.memory_space<vmem>>, vector<1x64x256xf32>,
    return
  }
  func.func @transform_0(%arg0: i32, %arg1: i32) -> (i32, i32, i32) {
    %c0_i32 = arith.constant 0 : i32
    %c0_i32_0 = arith.constant 0 : i32
    return %arg0, %c0_i32, %arg1 : i32, i32, i32
  }
  func.func @transform_1(%arg0: i32, %arg1: i32) -> (i32, i32) {
    %c0_i32 = arith.constant 0 : i32
    %c0_i32_0 = arith.constant 0 : i32
    %c0_i32_1 = arith.constant 0 : i32
    return %c0_i32, %c0_i32_0 : i32, i32
  }
  func.func @transform_2(%arg0: i32, %arg1: i32) -> (i32, i32) {
    %c0_i32 = arith.constant 0 : i32
    %c0_i32_0 = arith.constant 0 : i32
    %c0_i32_1 = arith.constant 0 : i32
    return %c0_i32, %c0_i32_0 : i32, i32
  }
  func.func @transform_3(%arg0: i32, %arg1: i32) -> (i32, i32) {
    %c0_i32 = arith.constant 0 : i32
    %c0_i32_0 = arith.constant 0 : i32
    %c0_i32_1 = arith.constant 0 : i32
    return %c0_i32, %c0_i32_0 : i32, i32
  }
  func.func @transform_4(%arg0: i32, %arg1: i32) -> (i32, i32, i32) {
    %c0_i32 = arith.constant 0 : i32
    %c0_i32_0 = arith.constant 0 : i32
    return %arg0, %c0_i32, %arg1 : i32, i32, i32
  }
}

</mosaic_0001>

<bundles_post_ra>
// kernel: tpu_custom_call.1
= control target key start
LH: loop header
LB: loop body
LE: loop exit
PB: predicated region body
PF: predicated region fallthrough
CT: control target
= control target key end

     0   :  { %9 = vsyncpa [#allocation3], 0  ;;  %s1493_s0 = inlined_call_operand.hbm [shape: f32[2,64,256], index: 0, kind: input, shape index: {}]   ;;  %s1494_s1 = inlined_call_operand.vmem [shape: f32[64,1], index: 1, kind: input, shape index: {}]   ;;  %s1495_s2 = inlined_call_operand.vmem [shape: f32[64,1], index: 2, kind: input, shape index: {}]   ;;  %s1496_s3 = inlined_call_operand.vmem [shape: f32[64,64], index: 3, kind: input, shape index: {}]   ;;  %s1497_s4 = inlined_call_operand.hbm [shape: f32[2,64,256], index: 4, kind: output, shape index: {}]  }
   0x1   :  { %11 = vsyncpa [#allocation3 + $0x1], 0 }
   0x2   :  { %12 = vsyncpa [#allocation4], 0 }
   0x3   :  { %14 = vsyncpa [#allocation4 + $0x1], 0  ;;  %s1049_s15 = smov 0   ;;  %s1051_s16 = smov 0  }
   0x4   :  { %s1053_s17 = smov 0   ;;  %s1055_s18 = smov 0  }
   0x5   :  { %s1057_s19 = smov 0   ;;  %s1059_s20 = smov 0  }
   0x6 LB: > { %s775_s21 = sadd.s32 4294967295, %s1014_s20   ;;  %s776_s22 = sadd.s32 4294967294, %s1014_s20   ;;  %s1014_s20 = sphi %s1059_s20, %s20_s20   ;;  %s1010_s19 = sphi %s1057_s19, %s1512_s19   ;;  %s1006_s18 = sphi %s1055_s18, %s1511_s18   ;;  %s1002_s17 = sphi %s1053_s17, %s1510_s17   ;;  %s998_s16 = sphi %s1051_s16, %s1509_s16   ;;  %s994_s15 = sphi %s1049_s15, %s1508_s15  }
   0x7   : > { %s32_s23 = sadd.s32 1, %s1010_s19  ;;  %s41_s24 = sadd.s32 1, %s1002_s17 }
   0x8   : > { %p34_p0 = scmp.ge.s32.totalorder %s32_s23, 2  ;;  %p48_p1 = scmp.ne.s32.totalorder %s1002_s17, %s998_s16 }
   0x9   : > { %p49_p2 = scmp.eq.s32.totalorder %s1014_s20, 0  ;;  %p54_p3 = scmp.ne.s32.totalorder %s998_s16, %s994_s15 }
   0xa   : > { %s1514_s23 = smov (%p34_p0, %s32_s23), 0  ;;  %p55_p5 = scmp.eq.s32.totalorder %s775_s21, 0 }
   0xb   : > { %p1090_p4 = por %p49_p2, %p48_p1  ;;  %s36_s26 = ssub.s32 %s1010_s19, %s1514_s23 }
   0xc   : > { %p143_p6 = scmp.eq.s32.totalorder %s775_s21, 1  ;;  %p39_p7 = scmp.eq.s32.totalorder %s36_s26, 0 }
   0xd   : > { %p1096_p8 = por %p55_p5, %p54_p3  ;;  %p149_p10 = scmp.eq.s32.totalorder %s776_s22, 1 }
   0xe   : > { %p1100_p9 = por %p143_p6, %p48_p1  ;;  %p836_p13 = scmp.lt.s32.totalorder %s1014_s20, 2 }
   0xf   : > { %s1105_s29 = scalar_select %p39_p7, %s1002_s17, %s41_s24  }
  0x10   : > { %s1501_s28 = scalar_select %p1100_p9, 1, 0 }
  0x11   : > { %p1107_p11 = por %p149_p10, %p54_p3  ;;  %s178_s5 = sand.u32 1, %s1002_s17  }
  0x12   : > { %s779_s6 = sshll.u32 %s178_s5, 7  ;;  %s798_s7 = sshll.u32 %s1010_s19, 11 }
  0x13   : > { %s1502_s30 = scalar_select %p1107_p11, 1, 0 }
  0x14   : > { %s1118_s10 = scalar_lea.hbm %s1493_s0, %s798_s7  ;;  %s182_s11 = scalar_lea.vmem [#allocation2], %s779_s6 }
  0x15   : > { %s191_s12 = sshll.u32 %s182_s11, 4  ;;  %p1124_p0 = pnand %p836_p13, %p1090_p4  ;;  %s1120_s12 = int_to_ptr.vmem [resolvable:$true] %s191_s12 }
  0x16   : > { %s1129_s14 = scalar_lea.sflag [#allocation3], %s178_s5  ;;  %s902_s21 = scalar_lea.hbm %s1118_s10, 2048 }
  0x17   : > { %p903_p2 = scmp.ne.s32.totalorder %s1118_s10, %s902_s21  ;;  %p904_p3 = pneg %p1124_p0 }
  0x18   : > { %s907_s25 = scalar_lea.hbm %s1493_s0, 4096  ;;  %p908_p4 = scmp.lt.u32.totalorder %s1118_s10, %s1493_s0 }
  0x19   : > { %p905_p5 = pnand %p904_p3, %p903_p2  ;;  %p909_p7 = scmp.lt.u32.totalorder %s907_s25, %s902_s21 }
  0x1a   : > { %p911_p13 = scmp.lt.u32.totalorder %s902_s21, %s1118_s10 }
  0x1b   : > { %p906_p6 = pneg %p905_p5  ;;  %p910_p10 = por %p909_p7, %p908_p4 }
  0x1d   : > { %p912_p12 = por %p911_p13, %p910_p10 }
  0x1f   : > { %p913_p1 = pnand %p912_p12, %p906_p6 }
  0x21   : > { %916 = shalt.err (!%p913_p1)
}
  0x22   : > { %s917_s5 = scalar_lea.vmem %s1120_s12, 2048  ;;  %s1016_s7 = smov [#allocation2]  }
  0x23   : > { %p918_p2 = scmp.ne.s32.totalorder %s1120_s12, %s917_s5  ;;  %s922_s8 = sshll.u32 %s1016_s7, 4  ;;  %s923_s8 = int_to_ptr.vmem [resolvable:$false] %s922_s8 }
  0x24   : > { %s924_s9 = scalar_lea.vmem %s923_s8, 4096  ;;  %p925_p9 = scmp.lt.s32.totalorder %s1120_s12, %s923_s8 }
  0x25   : > { %p920_p5 = pnand %p918_p2, %p904_p3  ;;  %p926_p4 = scmp.lt.s32.totalorder %s924_s9, %s917_s5 }
  0x27   : > { %p921_p11 = pneg %p920_p5  ;;  %p927_p7 = por %p926_p4, %p925_p9 }
  0x29   : > { %p928_p10 = pnand %p927_p7, %p921_p11 }
  0x2b   : > { %931 = shalt.err (!%p928_p10)
}
  0x2c   : > { %s1017_s11 = smov 256   ;;  %s1018_s21 = smov 16  }
  0x2d   : > { %831 = dma.hbm_to_vmem [thread:$0]  (!%p1124_p0), %s1118_s10, 2048, %s1120_s12, %s1129_s14, %s1017_s11, %s1017_s11, %s1018_s21  }
  0x2e   : > { %p199_p12 = scmp.lt.s32.totalorder %s1014_s20, 3  ;;  %p1504_p1 = scmp.ge.s32.totalorder %s1014_s20, 1 }
  0x30   : > { %p200_p3 = pnand %p1504_p1, %p199_p12 }
  0x31   : > { %s1161_s22 = sand.u32 (!%p200_p3), 1, %s998_s16  }
  0x32   : > { %203 = sbr.rel (%p200_p3) target bundleno = 464 (0x1d0), region = 36  ;;  %s783_s24 = sshll.u32 (!%p200_p3), %s1161_s22, 7 }
  0x33   : > { %s206_s25 = scalar_lea.sflag (!%p200_p3), [#allocation3], %s1161_s22  ;;  %s1167_s26 = scalar_lea.vmem (!%p200_p3), [#allocation2], %s783_s24 }
  0x39   : > { %985 = dma.done.wait (%p1096_p8), %s206_s25, 2048  }
  0x3a   : > { %987 = vsyncadd (%p1096_p8), %s206_s25, 4294965248  ;;  %v1019_v0 = vmov 0   ;;  %v446_v1 = vld [vmem:[%s1495_s2] sm:$0xff]  ;;  %v447_v3 = vld [vmem:[%s1495_s2 + $0x8] sm:$0xff]  ;;  %v1020_v56 = vmov 0.0   ;;  %vm518_vm4 = vcmask 523264  }
  0x3b   : > { %893 = vset.pattern.permute.xlu1 %v1019_v0  ;;  %892 = vset.pattern.permute.xlu0 %v1019_v0  ;;  %v382_v2 = vld [vmem:[%s1494_s1] sm:$0xff]  ;;  %v383_v4 = vld [vmem:[%s1494_s1 + $0x8] sm:$0xff]  ;;  %v385_v5 = vld [vmem:[%s1494_s1 + $0x18] sm:$0xff]  ;;  %s1419_s7 = scalar_lea.vmem [#allocation5], %s783_s24  ;;  %s799_s24 = sshll.u32 %s1006_s18, 11 }
  0x3c   : > { %456 = vperm.xlu1 %893, %v446_v1   ;;  %392 = vperm.xlu0 %892, %v382_v2   ;;  %v384_v6 = vld [vmem:[%s1494_s1 + $0x10] sm:$0xff]  ;;  %v449_v7 = vld [vmem:[%s1495_s2 + $0x18] sm:$0xff]  ;;  %v387_v9 = vld [vmem:[%s1494_s1 + $0x28] sm:$0xff]  ;;  %s688_s8 = sshll.u32 %s1419_s7, 4  ;;  %s1438_s21 = scalar_lea.hbm %s1497_s4, %s799_s24  ;;  %s1440_s8 = int_to_ptr.vmem [resolvable:$true] %s688_s8 }
  0x3d   : > { %v448_v8 = vld [vmem:[%s1495_s2 + $0x10] sm:$0xff]  ;;  %v386_v10 = vld [vmem:[%s1494_s1 + $0x20] sm:$0xff]  ;;  %v1210_v13 = vld [vmem:[%s1167_s26 + $0x8] sm:$0xff]  ;;  %607 = vmatprep.mubr.f32.mxu0 %v1020_v56  ;;  %631 = vmatprep.mubr.f32.mxu1 %v1020_v56  ;;  %s673_s18 = scalar_lea.sflag [#allocation4], %s1161_s22  ;;  %s932_s25 = scalar_lea.vmem %s1440_s8, 2048 }
  0x3e   : > { %v1204_v11 = vld [vmem:[%s1167_s26] sm:$0xff]  ;;  %v1207_v12 = vld [vmem:[%s1167_s26 + $0x10] sm:$0xff]  ;;  %v1213_v14 = vld [vmem:[%s1167_s26 + $0x18] sm:$0xff]  ;;  %v279_v22 = vmul.f32 %v1210_v13, %v1210_v13  ;;  %p933_p8 = scmp.ne.s32.totalorder %s1440_s8, %s932_s25  ;;  %p1505_p9 = scmp.ne.s32.totalorder %s1501_s28, 0 }
  0x3f   : > { %v451_v15 = vld [vmem:[%s1495_s2 + $0x28] sm:$0xff]  ;;  %v450_v16 = vld [vmem:[%s1495_s2 + $0x20] sm:$0xff]  ;;  %v252_v17 = vadd.f32 %v1207_v12, %v1204_v11  ;;  %v278_v18 = vmul.f32 %v1204_v11, %v1204_v11  ;;  %v280_v19 = vmul.f32 %v1207_v12, %v1207_v12  ;;  %v265_v21 = vadd.f32 %v1213_v14, %v1210_v13  ;;  %v389_v25 = vld [vmem:[%s1494_s1 + $0x38] sm:$0xff]  ;;  %s1021_s10 = smov [#allocation5]  }
  0x40   : > { %461 = vperm.xlu1 %893, %v447_v3   ;;  %397 = vperm.xlu0 %892, %v383_v4   ;;  %v1228_v20 = vld [vmem:[%s1167_s26 + $0x20] sm:$0xff]  ;;  %v281_v23 = vmul.f32 %v1213_v14, %v1213_v14  ;;  %v1237_v24 = vld [vmem:[%s1167_s26 + $0x28] sm:$0xff]  ;;  %v388_v26 = vld [vmem:[%s1494_s1 + $0x30] sm:$0xff]  ;;  %p934_p11 = pnand %p933_p8, %p1505_p9  ;;  %s936_s12 = sshll.u32 %s1021_s10, 4  ;;  %s937_s12 = int_to_ptr.vmem [resolvable:$false] %s936_s12 }
  0x41   : > { %v253_v27 = vadd.f32 %v252_v17, %v1228_v20  ;;  %v282_v28 = vmul.f32 %v1228_v20, %v1228_v20  ;;  %v294_v29 = vadd.f32 %v280_v19, %v278_v18  ;;  %v1249_v30 = vld [vmem:[%s1167_s26 + $0x30] sm:$0xff]  ;;  %v266_v31 = vadd.f32 %v265_v21, %v1237_v24  ;;  %v1255_v34 = vld [vmem:[%s1167_s26 + $0x38] sm:$0xff]  ;;  %v1267_v40 = vld [vmem:[%s1167_s26 + $0x40] sm:$0xff]  ;;  %s938_s13 = scalar_lea.vmem %s937_s12, 4096  ;;  %p939_p6 = scmp.lt.s32.totalorder %s1440_s8, %s937_s12 }
  0x42   : > { %v283_v32 = vmul.f32 %v1237_v24, %v1237_v24  ;;  %v307_v33 = vadd.f32 %v281_v23, %v279_v22  ;;  %v453_v35 = vld [vmem:[%s1495_s2 + $0x38] sm:$0xff]  ;;  %v452_v36 = vld [vmem:[%s1495_s2 + $0x30] sm:$0xff]  ;;  %v284_v38 = vmul.f32 %v1249_v30, %v1249_v30  ;;  %v285_v42 = vmul.f32 %v1255_v34, %v1255_v34  ;;  %v1273_v44 = vld [vmem:[%s1167_s26 + $0x48] sm:$0xff]  ;;  %p935_p0 = pneg %p934_p11  ;;  %p940_p13 = scmp.lt.s32.totalorder %s938_s13, %s932_s25 }
  0x43   : > { %v254_v37 = vadd.f32 %v253_v27, %v1249_v30  ;;  %v295_v39 = vadd.f32 %v294_v29, %v282_v28  ;;  %v267_v41 = vadd.f32 %v266_v31, %v1255_v34  ;;  %v286_v46 = vmul.f32 %v1267_v40, %v1267_v40  ;;  %v1279_v48 = vld [vmem:[%s1167_s26 + $0x50] sm:$0xff]  ;;  %v1285_v52 = vld [vmem:[%s1167_s26 + $0x58] sm:$0xff]  ;;  %v1292_v57 = vld [vmem:[%s1167_s26 + $0x60] sm:$0xff] }
  0x44   : > { %407 = vperm.xlu1 %893, %v385_v5   ;;  %402 = vperm.xlu0 %892, %v384_v6   ;;  %v308_v43 = vadd.f32 %v307_v33, %v283_v32  ;;  %v287_v50 = vmul.f32 %v1273_v44, %v1273_v44  ;;  %v288_v54 = vmul.f32 %v1279_v48, %v1279_v48  ;;  %v1299_v61 = vld [vmem:[%s1167_s26 + $0x68] sm:$0xff]  ;;  %v1305_v1 = vld [vmem:[%s1167_s26 + $0x70] sm:$0xff]  ;;  %v1311_v5 = vld [vmem:[%s1167_s26 + $0x78] sm:$0xff]  ;;  %p941_p2 = por %p940_p13, %p939_p6 }
  0x45   : > { %v255_v45 = vadd.f32 %v254_v37, %v1267_v40  ;;  %v296_v47 = vadd.f32 %v295_v39, %v284_v38  ;;  %v268_v49 = vadd.f32 %v267_v41, %v1273_v44  ;;  %v289_v59 = vmul.f32 %v1285_v52, %v1285_v52 }
  0x46   : > { %v309_v51 = vadd.f32 %v308_v43, %v285_v42  ;;  %v290_v63 = vmul.f32 %v1292_v57, %v1292_v57  ;;  %v291_v3 = vmul.f32 %v1299_v61, %v1299_v61  ;;  %p942_p5 = pnand %p941_p2, %p935_p0 }
  0x47   : > { %v256_v53 = vadd.f32 %v255_v45, %v1279_v48  ;;  %v297_v55 = vadd.f32 %v296_v47, %v286_v46  ;;  %v269_v58 = vadd.f32 %v268_v49, %v1285_v52 }
  0x48   : > { %471 = vperm.xlu1 %893, %v449_v7   ;;  %466 = vperm.xlu0 %892, %v448_v8   ;;  %v310_v60 = vadd.f32 %v309_v51, %v287_v50  ;;  %v292_v7 = vmul.f32 %v1305_v1, %v1305_v1 }
  0x49   : > { %v257_v62 = vadd.f32 %v256_v53, %v1292_v57  ;;  %v298_v0 = vadd.f32 %v297_v55, %v288_v54  ;;  %v270_v2 = vadd.f32 %v269_v58, %v1299_v61 }
  0x4a   : > { %v311_v4 = vadd.f32 %v310_v60, %v289_v59 }
  0x4b   : > { %v258_v6 = vadd.f32 %v257_v62, %v1305_v1  ;;  %v299_v8 = vadd.f32 %v298_v0, %v290_v63 }
  0x4c   : > { %417 = vperm.xlu1 %893, %v387_v9   ;;  %412 = vperm.xlu0 %892, %v386_v10   ;;  %v271_v9 = vadd.f32 %v270_v2, %v1311_v5  ;;  %v293_v10 = vmul.f32 %v1311_v5, %v1311_v5 }
  0x4d   : > { %v300_v17 = vadd.f32 %v299_v8, %v292_v7 }
  0x4e   : > { %v272_v18 = vrot.slane %v271_v9, 4 }
  0x4f   : > { %v301_v22 = vrot.slane %v300_v17, 4 }
  0x50   : > { %481 = vperm.xlu1 %893, %v451_v15   ;;  %476 = vperm.xlu0 %892, %v450_v16   ;;  %v312_v15 = vadd.f32 %v311_v4, %v291_v3  ;;  %v259_v16 = vrot.slane %v258_v6, 4  ;;  %v273_v23 = vadd.f32 %v272_v18, %v271_v9 }
  0x51   : > { %v302_v27 = vadd.f32 %v301_v22, %v300_v17 }
  0x52   : > { %v313_v19 = vadd.f32 %v312_v15, %v293_v10  ;;  %v260_v21 = vadd.f32 %v259_v16, %v258_v6  ;;  %v274_v28 = vrot.slane %v273_v23, 2 }
  0x53   : > { %v303_v32 = vrot.slane %v302_v27, 2 }
  0x54   : > { %427 = vperm.xlu1 %893, %v389_v25   ;;  %422 = vperm.xlu0 %892, %v388_v26   ;;  %v314_v25 = vrot.slane %v313_v19, 4  ;;  %v261_v26 = vrot.slane %v260_v21, 2  ;;  %v275_v33 = vadd.f32 %v274_v28, %v273_v23 }
  0x55   : > { %v304_v37 = vadd.f32 %v303_v32, %v302_v27 }
  0x56   : > { %v315_v29 = vadd.f32 %v314_v25, %v313_v19  ;;  %v262_v31 = vadd.f32 %v261_v26, %v260_v21  ;;  %v276_v38 = vrot.slane %v275_v33, 1 }
  0x57   : > { %v305_v42 = vrot.slane %v304_v37, 1 }
  0x58   : > { %491 = vperm.xlu1 %893, %v453_v35   ;;  %486 = vperm.xlu0 %892, %v452_v36   ;;  %v316_v35 = vrot.slane %v315_v29, 2  ;;  %v263_v36 = vrot.slane %v262_v31, 1  ;;  %v277_v43 = vadd.f32 %v276_v38, %v275_v33 }
  0x59   : > { %v306_v46 = vadd.f32 %v305_v42, %v304_v37 }
  0x5a   : > { %v317_v39 = vadd.f32 %v316_v35, %v315_v29  ;;  %v264_v41 = vadd.f32 %v263_v36, %v262_v31  ;;  %v1321_v50 = vmul.f32 0.015625, %v277_v43 }
  0x5b   : > { %v322_v51 = vmul.f32 0.015625, %v306_v46 }
  0x5c   : > { %v318_v45 = vrot.slane %v317_v39, 1  ;;  %v1319_v47 = vmul.f32 0.015625, %v264_v41  ;;  %v325_v55 = vmul.f32 %v1321_v50, %v1321_v50  ;;  %v351_v19 = vsub.f32 %v1210_v13, %v1321_v50 }
  0x5d   : > { %v353_v23 = vsub.f32 %v1213_v14, %v1321_v50  ;;  %v355_v14 = vsub.f32 %v1237_v24, %v1321_v50 }
  0x5e   : > { %v319_v49 = vadd.f32 %v318_v45, %v317_v39  ;;  %v324_v53 = vmul.f32 %v1319_v47, %v1319_v47  ;;  %v350_v18 = vsub.f32 %v1204_v11, %v1319_v47  ;;  %v352_v22 = vsub.f32 %v1207_v12, %v1319_v47 }
  0x5f   : > { %v356_v13 = vsub.f32 %v1249_v30, %v1319_v47  ;;  %v354_v31 = vsub.f32 %v1228_v20, %v1319_v47  ;;  %v357_v12 = vsub.f32 %v1255_v34, %v1321_v50 }
  0x60   : > { %v323_v54 = vmul.f32 0.015625, %v319_v49  ;;  %v326_v58 = vsub.f32 %v322_v51, %v324_v53  ;;  %v360_v49 = vsub.f32 %v1279_v48, %v1319_v47  ;;  %v361_v51 = vsub.f32 %v1285_v52, %v1321_v50 }
  0x62   : > { %v327_v59 = vsub.f32 %v323_v54, %v325_v55  ;;  %v328_v60 = vmax.f32 %v326_v58, 0.0  ;;  %v358_v55 = vsub.f32 %v1267_v40, %v1319_v47  ;;  %v359_v58 = vsub.f32 %v1273_v44, %v1321_v50 }
  0x64   : > { %v329_v62 = vmax.f32 %v327_v59, 0.0  ;;  %894 = vrsqrt.f32 %v328_v60  ;;  %vm332_vm0 = vcmp.eq.f32.partialorder %v328_v60, inf  ;;  %v335_v4 = vand.u32 2147483648, %v328_v60 }
  0x65   : > { %vm334_vm2 = vcmp.eq.f32.partialorder %v328_v60, 0.0 }
  0x66   : > { %896 = vrsqrt.f32 %v329_v62  ;;  %vm339_vm1 = vcmp.eq.f32.partialorder %v329_v62, inf  ;;  %v342_v7 = vand.u32 2147483648, %v329_v62  ;;  %vm341_vm3 = vcmp.eq.f32.partialorder %v329_v62, 0.0 }
  0x6e   : > { %v895_v63 = vpop.eup %894 }
  0x6f   : > { %v331_v2 = vmul.f32 %v895_v63, %v328_v60 }
  0x70   : > { %v897_v0 = vpop.eup %896 }
  0x71   : > { %v338_v3 = vmul.f32 %v897_v0, %v329_v62  ;;  %v333_v6 = vsel %vm332_vm0, %v328_v60, %v331_v2 }
  0x72   : > { %v336_v9 = vsel %vm334_vm2, %v335_v4, %v333_v6 }
  0x73   : > { %v340_v8 = vsel %vm339_vm1, %v329_v62, %v338_v3  ;;  %v344_v15 = vadd.f32 1e-05, %v336_v9 }
  0x74   : > { %v343_v10 = vsel %vm341_vm3, %v342_v7, %v340_v8 }
  0x75   : > { %v345_v16 = vadd.f32 1e-05, %v343_v10  ;;  %898 = vrcp.f32 %v344_v15 }
  0x77   : > { %900 = vrcp.f32 %v345_v16  ;;  %v364_v16 = vsub.f32 %v1305_v1, %v1319_v47 }
  0x7f   : > { %v1327_v17 = vpop.eup %898 }
  0x80   : > { %v366_v27 = vmul.f32 %v1327_v17, %v350_v18  ;;  %v368_v29 = vmul.f32 %v1327_v17, %v352_v22  ;;  %v372_v39 = vmul.f32 %v1327_v17, %v356_v13  ;;  %v370_v41 = vmul.f32 %v1327_v17, %v354_v31 }
  0x81   : > { %v1333_v21 = vpop.eup %900  ;;  %v376_v6 = vmul.f32 %v1327_v17, %v360_v49  ;;  %v374_v8 = vmul.f32 %v1327_v17, %v358_v55  ;;  %v365_v18 = vsub.f32 %v1311_v5, %v1321_v50  ;;  %v363_v22 = vsub.f32 %v1299_v61, %v1321_v50  ;;  %v516_v49 = vld [vmem:[%s1496_s3 + $0x30] sm:$0xff] }
  0x82   : > { %v367_v28 = vmul.f32 %v1333_v21, %v351_v19  ;;  %v369_v11 = vmul.f32 %v1333_v21, %v353_v23  ;;  %v373_v30 = vmul.f32 %v1333_v21, %v357_v12  ;;  %v371_v20 = vmul.f32 %v1333_v21, %v355_v14 }
  0x83   : > { %v377_v40 = vmul.f32 %v1333_v21, %v361_v51  ;;  %v375_v9 = vmul.f32 %v1333_v21, %v359_v58  ;;  %v362_v19 = vsub.f32 %v1292_v57, %v1319_v47  ;;  %v380_v12 = vmul.f32 %v1327_v17, %v364_v16  ;;  %v513_v51 = vld [vmem:[%s1496_s3 + $0x18] sm:$0xff] }
  0x84   : > { %v381_v5 = vmul.f32 %v1333_v21, %v365_v18  ;;  %v379_v61 = vmul.f32 %v1333_v21, %v363_v22  ;;  %v510_v21 = vld [vmem:[%s1496_s3] sm:$0xff] }
  0x85   : > { %v378_v47 = vmul.f32 %v1327_v17, %v362_v19 }
  0xbb   : > { %v457_v25 = vpop.permute.xlu1 %456  ;;  %v393_v26 = vpop.permute.xlu0 %392 }
  0xbc   : > { %v430_v32 = vmul.f32 %v393_v26, %v366_v27  ;;  %v431_v33 = vmul.f32 %v393_v26, %v367_v28 }
  0xbe   : > { %v495_v46 = vadd.f32 %v457_v25, %v431_v33  ;;  %v494_v24 = vadd.f32 %v457_v25, %v430_v32 }
  0xbf   : > { %v462_v35 = vpop.permute.xlu1 %461  ;;  %v398_v36 = vpop.permute.xlu0 %397 }
  0xc0   : > { %v432_v37 = vmul.f32 %v398_v36, %v368_v29  ;;  %v433_v38 = vmul.f32 %v398_v36, %v369_v11 }
  0xc2   : > { %v497_v42 = vadd.f32 %v462_v35, %v433_v38  ;;  %v496_v43 = vadd.f32 %v462_v35, %v432_v37 }
  0xc3   : > { %v408_v34 = vpop.permute.xlu1 %407  ;;  %v403_v45 = vpop.permute.xlu0 %402 }
  0xc4   : > { %v800_v53 = vpack.c.bf16 %v497_v42, %v495_v46  ;;  %v802_v54 = vpack.c.bf16 %v496_v43, %v494_v24  ;;  %v436_v59 = vmul.f32 %v408_v34, %v372_v39  ;;  %v437_v60 = vmul.f32 %v408_v34, %v373_v30  ;;  %v514_v34 = vld [vmem:[%s1496_s3 + $0x20] sm:$0xff]  ;;  %v515_v46 = vld [vmem:[%s1496_s3 + $0x28] sm:$0xff]  ;;  %v512_v24 = vld [vmem:[%s1496_s3 + $0x10] sm:$0xff] }
  0xc5   : > { %v434_v62 = vmul.f32 %v403_v45, %v370_v41  ;;  %v435_v63 = vmul.f32 %v403_v45, %v371_v20  ;;  %v511_v45 = vld [vmem:[%s1496_s3 + $0x8] sm:$0xff] }
  0xc6   : > { %801 = vmatprep.subr.bf16.mxu0 %v800_v53  ;;  %816 = vmatprep.subr.bf16.mxu1 %v800_v53  ;;  %v517_v53 = vld [vmem:[%s1496_s3 + $0x38] sm:$0xff] }
  0xc7   : > { %v472_v0 = vpop.permute.xlu1 %471  ;;  %v467_v2 = vpop.permute.xlu0 %466  ;;  %803 = vmatpush1.bf16.msra.mxu0 %v802_v54  ;;  %820 = vmatpush1.bf16.msra.mxu1 %v802_v54 }
  0xc8   : > { %v500_v48 = vadd.f32 %v472_v0, %v436_v59  ;;  %v501_v3 = vadd.f32 %v472_v0, %v437_v60  ;;  %v498_v4 = vadd.f32 %v467_v2, %v434_v62  ;;  %v499_v52 = vadd.f32 %v467_v2, %v435_v63 }
  0xca   : > { %v804_v7 = vpack.c.bf16 %v501_v3, %v499_v52  ;;  %v806_v44 = vpack.c.bf16 %v500_v48, %v498_v4 }
  0xcb   : > { %v418_v10 = vpop.permute.xlu1 %417  ;;  %v413_v15 = vpop.permute.xlu0 %412 }
  0xcc   : > { %805 = vmatprep.subr.bf16.mxu0 %v804_v7  ;;  %817 = vmatprep.subr.bf16.mxu1 %v804_v7  ;;  %v440_v23 = vmul.f32 %v418_v10, %v376_v6  ;;  %v441_v25 = vmul.f32 %v418_v10, %v377_v40  ;;  %v438_v26 = vmul.f32 %v413_v15, %v374_v8 }
  0xcd   : > { %807 = vmatpush1.bf16.msra.mxu0 %v806_v44  ;;  %v439_v27 = vmul.f32 %v413_v15, %v375_v9  ;;  %821 = vmatpush1.bf16.msra.mxu1 %v806_v44 }
  0xcf   : > { %v482_v28 = vpop.permute.xlu1 %481  ;;  %v477_v29 = vpop.permute.xlu0 %476 }
  0xd0   : > { %v504_v11 = vadd.f32 %v482_v28, %v440_v23  ;;  %v505_v1 = vadd.f32 %v482_v28, %v441_v25  ;;  %v502_v13 = vadd.f32 %v477_v29, %v438_v26  ;;  %v503_v31 = vadd.f32 %v477_v29, %v439_v27 }
  0xd2   : > { %v808_v14 = vpack.c.bf16 %v505_v1, %v503_v31  ;;  %v810_v57 = vpack.c.bf16 %v504_v11, %v502_v13 }
  0xd3   : > { %v428_v50 = vpop.permute.xlu1 %427  ;;  %v423_v32 = vpop.permute.xlu0 %422 }
  0xd4   : > { %809 = vmatprep.subr.bf16.mxu0 %v808_v14  ;;  %818 = vmatprep.subr.bf16.mxu1 %v808_v14  ;;  %v444_v33 = vmul.f32 %v428_v50, %v380_v12  ;;  %v445_v35 = vmul.f32 %v428_v50, %v381_v5  ;;  %v442_v36 = vmul.f32 %v423_v32, %v378_v47 }
  0xd5   : > { %811 = vmatpush1.bf16.msra.mxu0 %v810_v57  ;;  %v443_v37 = vmul.f32 %v423_v32, %v379_v61  ;;  %822 = vmatpush1.bf16.msra.mxu1 %v810_v57 }
  0xd7   : > { %v492_v38 = vpop.permute.xlu1 %491  ;;  %v487_v39 = vpop.permute.xlu0 %486 }
  0xd8   : > { %v508_v41 = vadd.f32 %v492_v38, %v444_v33  ;;  %v509_v30 = vadd.f32 %v492_v38, %v445_v35  ;;  %v506_v20 = vadd.f32 %v487_v39, %v442_v36  ;;  %v507_v42 = vadd.f32 %v487_v39, %v443_v37 }
  0xda   : > { %v812_v43 = vpack.c.bf16 %v509_v30, %v507_v42  ;;  %v814_v17 = vpack.c.bf16 %v508_v41, %v506_v20 }
  0xdc   : > { %813 = vmatprep.subr.bf16.mxu0 %v812_v43  ;;  %819 = vmatprep.subr.bf16.mxu1 %v812_v43 }
  0xdd   : > { %815 = vmatpush1.bf16.msra.mxu0 %v814_v17  ;;  %823 = vmatpush1.bf16.msra.mxu1 %v814_v17 }
  0xe0   : > { %785 = vmatmul.mubr.msk.f32.vlgmr.msra.gmra.mrb[0].mxu0 %vm518_vm4, %v510_v21  ;;  %789 = vmatmul.mubr.msk.f32.vlgmr.msra.gmra.mrb[0].mxu1 %vm518_vm4, %v514_v34 }
  0xe1   : > { %613 = vmatprep.mubr.f32.mxu0 %v1020_v56  ;;  %637 = vmatprep.mubr.f32.mxu1 %v1020_v56 }
  0xe4   : > { %786 = vmatmul.mubr.msk.f32.gmra.mrb[2].mxu0 %vm518_vm4, %v511_v45  ;;  %790 = vmatmul.mubr.msk.f32.gmra.mrb[2].mxu1 %vm518_vm4, %v515_v46 }
  0xe5   : > { %619 = vmatprep.mubr.f32.mxu0 %v1020_v56  ;;  %643 = vmatprep.mubr.f32.mxu1 %v1020_v56 }
  0xe8   : > { %787 = vmatmul.mubr.msk.f32.gmra.mrb[4].mxu0 %vm518_vm4, %v512_v24  ;;  %791 = vmatmul.mubr.msk.f32.gmra.mrb[4].mxu1 %vm518_vm4, %v516_v49 }
  0xe9   : > { %625 = vmatprep.mubr.f32.mxu0 %v1020_v56  ;;  %649 = vmatprep.mubr.f32.mxu1 %v1020_v56 }
  0xec   : > { %788 = vmatmul.mubr.msk.f32.gmra.mrb[6].mxu0 %vm518_vm4, %v513_v51  ;;  %792 = vmatmul.mubr.msk.f32.gmra.mrb[6].mxu1 %vm518_vm4, %v517_v53 }
 0x1b3   : > { %v609_v54 = vpop.f32.mrb[0].mxu0  ;;  %v633_v55 = vpop.f32.mrb[0].mxu1 }
 0x1b4   : > { %656 = vst [vmem:[%s1419_s7] sm:$0xff] %v609_v54  ;;  %664 = vst [vmem:[%s1419_s7 + $0x40] sm:$0xff] %v633_v55  ;;  %v611_v56 = vpop.f32.mrb[1].mxu0  ;;  %v635_v58 = vpop.f32.mrb[1].mxu1 }
 0x1b5   : > { %657 = vst [vmem:[%s1419_s7 + $0x8] sm:$0xff] %v611_v56  ;;  %665 = vst [vmem:[%s1419_s7 + $0x48] sm:$0xff] %v635_v58 }
 0x1b7   : > { %v615_v59 = vpop.f32.mrb[2].mxu0  ;;  %v639_v60 = vpop.f32.mrb[2].mxu1 }
 0x1b8   : > { %658 = vst [vmem:[%s1419_s7 + $0x10] sm:$0xff] %v615_v59  ;;  %666 = vst [vmem:[%s1419_s7 + $0x50] sm:$0xff] %v639_v60  ;;  %v617_v62 = vpop.f32.mrb[3].mxu0  ;;  %v641_v63 = vpop.f32.mrb[3].mxu1 }
 0x1b9   : > { %659 = vst [vmem:[%s1419_s7 + $0x18] sm:$0xff] %v617_v62  ;;  %667 = vst [vmem:[%s1419_s7 + $0x58] sm:$0xff] %v641_v63 }
 0x1bb   : > { %v621_v0 = vpop.f32.mrb[4].mxu0  ;;  %v645_v2 = vpop.f32.mrb[4].mxu1 }
 0x1bc   : > { %660 = vst [vmem:[%s1419_s7 + $0x20] sm:$0xff] %v621_v0  ;;  %668 = vst [vmem:[%s1419_s7 + $0x60] sm:$0xff] %v645_v2  ;;  %v623_v48 = vpop.f32.mrb[5].mxu0  ;;  %v647_v3 = vpop.f32.mrb[5].mxu1 }
 0x1bd   : > { %661 = vst [vmem:[%s1419_s7 + $0x28] sm:$0xff] %v623_v48  ;;  %669 = vst [vmem:[%s1419_s7 + $0x68] sm:$0xff] %v647_v3 }
 0x1bf   : > { %v627_v4 = vpop.f32.mrb[6].mxu0  ;;  %v651_v52 = vpop.f32.mrb[6].mxu1 }
 0x1c0   : > { %662 = vst [vmem:[%s1419_s7 + $0x30] sm:$0xff] %v627_v4  ;;  %670 = vst [vmem:[%s1419_s7 + $0x70] sm:$0xff] %v651_v52  ;;  %v629_v6 = vpop.f32.mrb[7].mxu0  ;;  %v653_v40 = vpop.f32.mrb[7].mxu1 }
 0x1c1   : > { %663 = vst [vmem:[%s1419_s7 + $0x38] sm:$0xff] %v629_v6  ;;  %671 = vst [vmem:[%s1419_s7 + $0x78] sm:$0xff] %v653_v40 }
 0x1c2   : > { %945 = shalt.err (!%p942_p5)
}
 0x1c3   : > { %s946_s14 = scalar_lea.hbm %s1438_s21, 2048  ;;  %s950_s26 = scalar_lea.hbm %s1497_s4, 4096 }
 0x1c4   : > { %p947_p4 = scmp.ne.s32.totalorder %s1438_s21, %s946_s14  ;;  %p951_p12 = scmp.lt.u32.totalorder %s1438_s21, %s1497_s4 }
 0x1c5   : > { %p952_p1 = scmp.lt.u32.totalorder %s950_s26, %s946_s14  ;;  %p954_p8 = scmp.lt.u32.totalorder %s946_s14, %s1438_s21 }
 0x1c6   : > { %p948_p7 = pnand %p947_p4, %p1505_p9 }
 0x1c7   : > { %p953_p3 = por %p952_p1, %p951_p12 }
 0x1c8   : > { %p949_p10 = pneg %p948_p7 }
 0x1c9   : > { %p955_p11 = por %p954_p8, %p953_p3 }
 0x1cb   : > { %p956_p0 = pnand %p955_p11, %p949_p10 }
 0x1cd   : > { %959 = shalt.err (!%p956_p0)
}
 0x1ce   : > { %s1022_s24 = smov 256   ;;  %s1023_s9 = smov 16  }
 0x1cf   : > { %826 = dma.vmem_to_hbm [thread:$0]  (%p1505_p9), %s1440_s8, 2048, %s1438_s21, %s673_s18, %s1022_s24, %s1022_s24, %s1023_s9  }
 0x1d0 PF: > { %s703_s11 = sand.u32 1, %s994_s15   ;;  %p1506_p6 = scmp.ne.s32.totalorder %s1502_s30, 0 }
 0x1d1   : > { %p1507_p13 = scmp.ge.s32.totalorder %s1014_s20, 2  ;;  %s704_s25 = scalar_lea.sflag [#allocation4], %s703_s11 }
 0x1d3   : > { %p833_p2 = pnand %p1507_p13, %p1506_p6 }
 0x1d5   : > { %989 = dma.done.wait (!%p833_p2), %s704_s25, 2048  }
 0x1d6   : > { %991 = vsyncadd (!%p833_p2), %s704_s25, 4294965248  ;;  %s20_s20 = sadd.s32 1, %s1014_s20   ;;  %s1508_s15 = smov %s998_s16 }
 0x1d7   : > { %p17_p5 = scmp.ge.s32.totalorder %s20_s20, 4   ;;  %s1509_s16 = smov %s1002_s17 }
 0x1d8   : > { %s1510_s17 = smov %s1105_s29  ;;  %s1511_s18 = smov %s1010_s19 }
 0x1d9   : > { %s1512_s19 = smov %s1514_s23  ;;  %19 = sbr.rel (!%p17_p5) target bundleno = 6 (0x6), region = 81 }
 0x1e0   :  { %709 = vsyncpa [#allocation3], 1 }
 0x1e1   :  { %711 = vsyncpa [#allocation3 + $0x1], 1 }
 0x1e2   :  { %712 = vsyncpa [#allocation4], 1 }
 0x1e3   :  { %714 = vsyncpa [#allocation4 + $0x1], 1 }

</bundles_post_ra>
